<compile_context>
chip_gen: v6e
topology: v6e:2x2x1
jax: 0.10.0
libtpu: 0.0.40
codegen_flags: <defaults>
</compile_context>

<pallas_src>
import jax
import jax.numpy as jnp
from jax.experimental import pallas as pl
from jax.experimental.pallas import tpu as pltpu

IN_DIM = 26     # true input features
IN_PAD = 32     # padded contraction dim (bf16-friendly sublane multiple)
HID = 64
OUT_DIM = 2     # true output features
TM_MAX = 4096   # max batch tile (rows), multiple of 128


def _round_up(n, m):
    return ((n + m - 1) // m) * m


def _elu(x):
    # ELU(alpha=1): x if x > 0 else exp(x) - 1.  Clamp the exp argument so the
    # discarded positive branch never produces inf.
    return jnp.where(x > 0, x, jnp.exp(jnp.minimum(x, 0.0)) - 1.0)


def mlp_kernel(x_ref, w1_ref, b1_ref, w2_ref, b2_ref, w3_ref, b3_ref, o_ref):
    # x tile: (tm, 32) f32 -> bf16 for the MXU; bias add / ELU / accum in f32.
    x = x_ref[...].astype(jnp.bfloat16)

    # Layer 1: (tm, 32) @ (32, 64)
    h = jnp.dot(x, w1_ref[...], preferred_element_type=jnp.float32) + b1_ref[...]
    h = _elu(h)

    # Layer 2: (tm, 64) @ (64, 64)
    h = jnp.dot(h.astype(jnp.bfloat16), w2_ref[...],
                preferred_element_type=jnp.float32) + b2_ref[...]
    h = _elu(h)

    # Layer 3: (tm, 64) @ (64, 2) -> slim (tm, 2) f32 output tile.
    y = jnp.dot(h.astype(jnp.bfloat16), w3_ref[...],
                preferred_element_type=jnp.float32) + b3_ref[...]
    o_ref[...] = y


def prepare_params(params):
    """One-time parameter prep, hoisted out of the per-call path.
    Weights -> bf16 (w1 padded 26->32 on the contraction dim); biases -> f32."""
    w1 = jnp.zeros((IN_PAD, HID), jnp.float32).at[:IN_DIM, :].set(params["w1"])
    return dict(
        w1=w1.astype(jnp.bfloat16),
        w2=params["w2"].astype(jnp.bfloat16),
        w3=params["w3"].astype(jnp.bfloat16),
        b1=params["b1"].reshape(1, HID).astype(jnp.float32),
        b2=params["b2"].reshape(1, HID).astype(jnp.float32),
        b3=params["b3"].reshape(1, OUT_DIM).astype(jnp.float32),
    )


def mlp_forward(x, prepared, *, tm_max=TM_MAX):
    """x: (B, 26) float. prepared: output of prepare_params. Returns (B, 2) f32."""
    B = x.shape[0]

    # ---- tile selection: amortize per-step overhead, bound pad waste ----
    num_tiles = max(1, pl.cdiv(B, tm_max))
    if B >= 256:
        num_tiles = max(num_tiles, 2)   # v7x: keep both TensorCores busy
    tm = _round_up(pl.cdiv(B, num_tiles), 128)
    b_pad = num_tiles * tm

    # ---- single wrapper pass over x: one pad (batch + 26->32), stays f32 ----
    x_p = jnp.pad(x.astype(jnp.float32),
                  ((0, b_pad - B), (0, IN_PAD - IN_DIM)))

    def resident(shape):
        # Full-array block, same block every grid step -> stays in VMEM.
        return pl.BlockSpec(shape, lambda i: (0, 0))

    cost = pl.CostEstimate(
        flops=2 * b_pad * (IN_DIM * HID + HID * HID + HID * OUT_DIM),
        transcendentals=2 * b_pad * HID,
        bytes_accessed=(b_pad * IN_PAD * 4              # x (f32)
                        + b_pad * OUT_DIM * 4           # out (f32)
                        + 2 * (IN_PAD * HID + HID * HID + HID * OUT_DIM)  # bf16 w
                        + 4 * (2 * HID + OUT_DIM)),     # f32 biases
    )

    out = pl.pallas_call(
        mlp_kernel,
        out_shape=jax.ShapeDtypeStruct((b_pad, OUT_DIM), jnp.float32),
        grid_spec=pltpu.PrefetchScalarGridSpec(
            num_scalar_prefetch=0,
            grid=(num_tiles,),
            in_specs=[
                pl.BlockSpec((tm, IN_PAD), lambda i: (i, 0)),   # x (pipelined)
                resident((IN_PAD, HID)),                        # w1
                resident((1, HID)),                             # b1
                resident((HID, HID)),                           # w2
                resident((1, HID)),                             # b2
                resident((HID, OUT_DIM)),                       # w3
                resident((1, OUT_DIM)),                         # b3
            ],
            out_specs=pl.BlockSpec((tm, OUT_DIM), lambda i: (i, 0)),
        ),
        compiler_params=pltpu.CompilerParams(
            dimension_semantics=("parallel",),   # v7x: shard batch over 2 TCs
        ),
        cost_estimate=cost,
    )(x_p, prepared["w1"], prepared["b1"], prepared["w2"], prepared["b2"],
      prepared["w3"], prepared["b3"])

    return out[:B]


def init_params(key):
    """PyTorch nn.Linear default init (U[-1/sqrt(fan_in), 1/sqrt(fan_in)]).
    Weights stored as (in_features, out_features) for the x @ W convention."""
    dims = [(IN_DIM, HID), (HID, HID), (HID, OUT_DIM)]
    params = {}
    for i, (fan_in, fan_out) in enumerate(dims, start=1):
        key, kw, kb = jax.random.split(key, 3)
        bound = 1.0 / jnp.sqrt(jnp.float32(fan_in))
        params[f"w{i}"] = jax.random.uniform(
            kw, (fan_in, fan_out), jnp.float32, minval=-bound, maxval=bound)
        params[f"b{i}"] = jax.random.uniform(
            kb, (1, fan_out), jnp.float32, minval=-bound, maxval=bound)
    return params


def mlp_reference(x, params):
    h = _elu(x @ params["w1"] + params["b1"])
    h = _elu(h @ params["w2"] + params["b2"])
    return h @ params["w3"] + params["b3"]


if __name__ == "__main__":
    key = jax.random.PRNGKey(0)
    kp, kx = jax.random.split(key)

    params = init_params(kp)
    prepared = prepare_params(params)          # one-time, outside the hot path

    batch = 8
    x = jax.random.normal(kx, (batch, IN_DIM), dtype=jnp.float32)

    fwd = jax.jit(lambda xx: mlp_forward(xx, prepared))
    out = jax.block_until_ready(fwd(x))

    ref = mlp_reference(x, params)
    assert out.shape == (batch, OUT_DIM)
    # bf16 MXU operands -> loosened tolerance vs the f32 reference.
    assert jnp.allclose(out, ref, atol=5e-2, rtol=5e-2)

    print("KERNEL_OK")
</pallas_src>

<mosaic_0001>
module attributes {stable_mosaic.version = 11 : i64} {
  func.func @mlp_kernel(%arg0: i32, %arg1: memref<128x32xf32, #tpu.memory_space<vmem>>, %arg2: memref<32x64xbf16, #tpu.memory_space<vmem>>, %arg3: memref<1x64xf32, #tpu.memory_space<vmem>>, %arg4: memref<64x64xbf16, #tpu.memory_space<vmem>>, %arg5: memref<1x64xf32, #tpu.memory_space<vmem>>, %arg6: memref<64x2xbf16, #tpu.memory_space<vmem>>, %arg7: memref<1x2xf32, #tpu.memory_space<vmem>>, %arg8: memref<128x2xf32, #tpu.memory_space<vmem>>) attributes {dimension_semantics = [#tpu.dimension_semantics<parallel>], iteration_bounds = array<i64: 1>, scalar_prefetch = 0 : i64, scratch_operands = 0 : i64, tpu.core_type = #tpu.core_type<tc>, window_params = [{transform_indices = @transform_0, window_bounds = array<i64: 128, 32>}, {pipeline_mode = #tpu.pipeline_mode<synchronous>, transform_indices = @transform_1, window_bounds = array<i64: 32, 64>}, {pipeline_mode = #tpu.pipeline_mode<synchronous>, transform_indices = @transform_2, window_bounds = array<i64: 1, 64>}, {pipeline_mode = #tpu.pipeline_mode<synchronous>, transform_indices = @transform_3, window_bounds = array<i64: 64, 64>}, {pipeline_mode = #tpu.pipeline_mode<synchronous>, transform_indices = @transform_4, window_bounds = array<i64: 1, 64>}, {pipeline_mode = #tpu.pipeline_mode<synchronous>, transform_indices = @transform_5, window_bounds = array<i64: 64, 2>}, {pipeline_mode = #tpu.pipeline_mode<synchronous>, transform_indices = @transform_6, window_bounds = array<i64: 1, 2>}, {transform_indices = @transform_7, window_bounds = array<i64: 128, 2>}]} {
    %c0 = arith.constant 0 : index
    %c0_0 = arith.constant 0 : index
    %0 = vector.load %arg1[%c0, %c0_0] : memref<128x32xf32, #tpu.memory_space<vmem>>, vector<128x32xf32>
    %1 = arith.truncf %0 : vector<128x32xf32> to vector<128x32xbf16>
    %c0_1 = arith.constant 0 : index
    %c0_2 = arith.constant 0 : index
    %2 = vector.load %arg2[%c0_1, %c0_2] : memref<32x64xbf16, #tpu.memory_space<vmem>>, vector<32x64xbf16>
    %cst = arith.constant dense<0.000000e+00> : vector<128x64xf32>
    %3 = tpu.matmul %1, %2, %cst {dimension_numbers = #tpu.dot_dimension_numbers<[1], [0], [0], [1], [0, 0, 1, 1], [], []>} : vector<128x32xbf16>, vector<32x64xbf16>, vector<128x64xf32> -> vector<128x64xf32>
    %c0_3 = arith.constant 0 : index
    %c0_4 = arith.constant 0 : index
    %4 = vector.load %arg3[%c0_3, %c0_4] : memref<1x64xf32, #tpu.memory_space<vmem>>, vector<1x64xf32>
    %5 = vector.broadcast %4 : vector<1x64xf32> to vector<128x64xf32>
    %6 = arith.addf %3, %5 : vector<128x64xf32>
    %cst_5 = arith.constant 0.000000e+00 : f32
    %7 = vector.broadcast %cst_5 : f32 to vector<128x64xf32>
    %8 = arith.cmpf ogt, %6, %7 : vector<128x64xf32>
    %cst_6 = arith.constant 0.000000e+00 : f32
    %9 = vector.broadcast %cst_6 : f32 to vector<128x64xf32>
    %10 = arith.minimumf %6, %9 : vector<128x64xf32>
    %11 = math.exp %10 : vector<128x64xf32>
    %cst_7 = arith.constant 1.000000e+00 : f32
    %12 = vector.broadcast %cst_7 : f32 to vector<128x64xf32>
    %13 = arith.subf %11, %12 : vector<128x64xf32>
    %14 = arith.select %8, %6, %13 : vector<128x64xi1>, vector<128x64xf32>
    %15 = arith.truncf %14 : vector<128x64xf32> to vector<128x64xbf16>
    %c0_8 = arith.constant 0 : index
    %c0_9 = arith.constant 0 : index
    %16 = vector.load %arg4[%c0_8, %c0_9] : memref<64x64xbf16, #tpu.memory_space<vmem>>, vector<64x64xbf16>
    %cst_10 = arith.constant dense<0.000000e+00> : vector<128x64xf32>
    %17 = tpu.matmul %15, %16, %cst_10 {dimension_numbers = #tpu.dot_dimension_numbers<[1], [0], [0], [1], [0, 0, 1, 1], [], []>} : vector<128x64xbf16>, vector<64x64xbf16>, vector<128x64xf32> -> vector<128x64xf32>
    %c0_11 = arith.constant 0 : index
    %c0_12 = arith.constant 0 : index
    %18 = vector.load %arg5[%c0_11, %c0_12] : memref<1x64xf32, #tpu.memory_space<vmem>>, vector<1x64xf32>
    %19 = vector.broadcast %18 : vector<1x64xf32> to vector<128x64xf32>
    %20 = arith.addf %17, %19 : vector<128x64xf32>
    %cst_13 = arith.constant 0.000000e+00 : f32
    %21 = vector.broadcast %cst_13 : f32 to vector<128x64xf32>
    %22 = arith.cmpf ogt, %20, %21 : vector<128x64xf32>
    %cst_14 = arith.constant 0.000000e+00 : f32
    %23 = vector.broadcast %cst_14 : f32 to vector<128x64xf32>
    %24 = arith.minimumf %20, %23 : vector<128x64xf32>
    %25 = math.exp %24 : vector<128x64xf32>
    %cst_15 = arith.constant 1.000000e+00 : f32
    %26 = vector.broadcast %cst_15 : f32 to vector<128x64xf32>
    %27 = arith.subf %25, %26 : vector<128x64xf32>
    %28 = arith.select %22, %20, %27 : vector<128x64xi1>, vector<128x64xf32>
    %29 = arith.truncf %28 : vector<128x64xf32> to vector<128x64xbf16>
    %c0_16 = arith.constant 0 : index
    %c0_17 = arith.constant 0 : index
    %30 = vector.load %arg6[%c0_16, %c0_17] : memref<64x2xbf16, #tpu.memory_space<vmem>>, vector<64x2xbf16>
    %cst_18 = arith.constant dense<0.000000e+00> : vector<128x2xf32>
    %31 = tpu.matmul %29, %30, %cst_18 {dimension_numbers = #tpu.dot_dimension_numbers<[1], [0], [0], [1], [0, 0, 1, 1], [], []>} : vector<128x64xbf16>, vector<64x2xbf16>, vector<128x2xf32> -> vector<128x2xf32>
    %c0_19 = arith.constant 0 : index
    %c0_20 = arith.constant 0 : index
    %32 = vector.load %arg7[%c0_19, %c0_20] : memref<1x2xf32, #tpu.memory_space<vmem>>, vector<1x2xf32>
    %33 = vector.broadcast %32 : vector<1x2xf32> to vector<128x2xf32>
    %34 = arith.addf %31, %33 : vector<128x2xf32>
    %c0_21 = arith.constant 0 : index
    %c0_22 = arith.constant 0 : index
    %35 = vector.load %arg8[%c0_21, %c0_22] : memref<128x2xf32, #tpu.memory_space<vmem>>, vector<128x2xf32>
    tpu.vector_store %arg8[%c0_21, %c0_22], %34 {strides = array<i32>} : memref<128x2xf32, #tpu.memory_space<vmem>>, vector<128x2xf32>,
    return
  }
  func.func @transform_0(%arg0: i32) -> (i32, i32) {
    %c0_i32 = arith.constant 0 : i32
    %c0_i32_0 = arith.constant 0 : i32
    return %arg0, %c0_i32 : i32, i32
  }
  func.func @transform_1(%arg0: i32) -> (i32, i32) {
    %c0_i32 = arith.constant 0 : i32
    %c0_i32_0 = arith.constant 0 : i32
    %c0_i32_1 = arith.constant 0 : i32
    return %c0_i32, %c0_i32_0 : i32, i32
  }
  func.func @transform_2(%arg0: i32) -> (i32, i32) {
    %c0_i32 = arith.constant 0 : i32
    %c0_i32_0 = arith.constant 0 : i32
    %c0_i32_1 = arith.constant 0 : i32
    return %c0_i32, %c0_i32_0 : i32, i32
  }
  func.func @transform_3(%arg0: i32) -> (i32, i32) {
    %c0_i32 = arith.constant 0 : i32
    %c0_i32_0 = arith.constant 0 : i32
    %c0_i32_1 = arith.constant 0 : i32
    return %c0_i32, %c0_i32_0 : i32, i32
  }
  func.func @transform_4(%arg0: i32) -> (i32, i32) {
    %c0_i32 = arith.constant 0 : i32
    %c0_i32_0 = arith.constant 0 : i32
    %c0_i32_1 = arith.constant 0 : i32
    return %c0_i32, %c0_i32_0 : i32, i32
  }
  func.func @transform_5(%arg0: i32) -> (i32, i32) {
    %c0_i32 = arith.constant 0 : i32
    %c0_i32_0 = arith.constant 0 : i32
    %c0_i32_1 = arith.constant 0 : i32
    return %c0_i32, %c0_i32_0 : i32, i32
  }
  func.func @transform_6(%arg0: i32) -> (i32, i32) {
    %c0_i32 = arith.constant 0 : i32
    %c0_i32_0 = arith.constant 0 : i32
    %c0_i32_1 = arith.constant 0 : i32
    return %c0_i32, %c0_i32_0 : i32, i32
  }
  func.func @transform_7(%arg0: i32) -> (i32, i32) {
    %c0_i32 = arith.constant 0 : i32
    %c0_i32_0 = arith.constant 0 : i32
    return %arg0, %c0_i32 : i32, i32
  }
}

</mosaic_0001>

<bundles_post_ra>
// kernel: _lambda_.1
= control target key start
LH: loop header
LB: loop body
LE: loop exit
PB: predicated region body
PF: predicated region fallthrough
CT: control target
= control target key end

     0   :  { %vm74_vm0 = vcmask 261120   ;;  %vm339_vm1 = vcmask 523264   ;;  %s1408_s1 = inlined_call_operand.vmem [shape: bf16[32,64], index: 1, kind: input, shape index: {}]   ;;  %s1409_s0 = inlined_call_operand.vmem [shape: f32[128,32], index: 0, kind: input, shape index: {}]   ;;  %s1410_s3 = inlined_call_operand.vmem [shape: bf16[64,64], index: 3, kind: input, shape index: {}]   ;;  %s1411_s2 = inlined_call_operand.vmem [shape: f32[1,64], index: 2, kind: input, shape index: {}]   ;;  %s1412_s5 = inlined_call_operand.vmem [shape: bf16[64,2], index: 5, kind: input, shape index: {}]   ;;  %s1413_s4 = inlined_call_operand.vmem [shape: f32[1,64], index: 4, kind: input, shape index: {}]   ;;  %s1414_s6 = inlined_call_operand.vmem [shape: f32[1,2], index: 6, kind: input, shape index: {}]   ;;  %s1415_s7 = inlined_call_operand.vmem [shape: f32[128,2], index: 7, kind: output, shape index: {}]  }
   0x1   :  { %v921_v0 = vld [vmem:[%s1408_s1 + $0x8] sm:$0xff]   ;;  %v922_v1 = vld [vmem:[%s1408_s1] sm:$0xff]   ;;  %v29_v7 = vld [vmem:[%s1409_s0 + $0x10] sm:$0xff] }
   0x2   :  { %849 = vmatprep.subr.bf16.mxu0 %v921_v0  ;;  %917 = vmatprep.subr.bf16.mxu1 %v921_v0  ;;  %v27_v2 = vld [vmem:[%s1409_s0] sm:$0xff]  ;;  %v28_v3 = vld [vmem:[%s1409_s0 + $0x8] sm:$0xff]  ;;  %v30_v8 = vld [vmem:[%s1409_s0 + $0x18] sm:$0xff] }
   0x3   :  { %v35_v4 = vld [vmem:[%s1409_s0 + $0x40] sm:$0xff]  ;;  %850 = vmatpush3.bf16.msra.mxu0 %v921_v0  ;;  %919 = vmatpush3.bf16.msra.mxu1 %v921_v0  ;;  %v43_v5 = vpack.c.bf16 %v28_v3, %v27_v2  ;;  %v36_v6 = vld [vmem:[%s1409_s0 + $0x48] sm:$0xff]  ;;  %v37_v10 = vld [vmem:[%s1409_s0 + $0x50] sm:$0xff]  ;;  %v44_v16 = vpack.c.bf16 %v30_v8, %v29_v7 }
   0x4   :  { %851 = vmatprep.subr.bf16.mxu0 %v922_v1  ;;  %918 = vmatprep.subr.bf16.mxu1 %v922_v1  ;;  %v47_v9 = vpack.c.bf16 %v36_v6, %v35_v4  ;;  %v38_v11 = vld [vmem:[%s1409_s0 + $0x58] sm:$0xff]  ;;  %v31_v12 = vld [vmem:[%s1409_s0 + $0x20] sm:$0xff]  ;;  %v32_v13 = vld [vmem:[%s1409_s0 + $0x28] sm:$0xff] }
   0x5   :  { %853 = vmatprep.mubr.msk.bf16.mxu0 %vm74_vm0, %v43_v5  ;;  %v39_v14 = vld [vmem:[%s1409_s0 + $0x60] sm:$0xff]  ;;  %v40_v15 = vld [vmem:[%s1409_s0 + $0x68] sm:$0xff]  ;;  %v48_v17 = vpack.c.bf16 %v38_v11, %v37_v10  ;;  %v45_v18 = vpack.c.bf16 %v32_v13, %v31_v12  ;;  %v33_v20 = vld [vmem:[%s1409_s0 + $0x30] sm:$0xff] }
   0x6   :  { %861 = vmatprep.mubr.msk.bf16.mxu1 %vm74_vm0, %v47_v9  ;;  %v49_v19 = vpack.c.bf16 %v40_v15, %v39_v14  ;;  %v34_v21 = vld [vmem:[%s1409_s0 + $0x38] sm:$0xff]  ;;  %v41_v22 = vld [vmem:[%s1409_s0 + $0x70] sm:$0xff]  ;;  %v925_v28 = vld [vmem:[%s1410_s3 + $0x8] sm:$0xff]  }
   0x7   :  { %852 = vmatpush3.bf16.msra.mxu0 %v922_v1  ;;  %920 = vmatpush3.bf16.msra.mxu1 %v922_v1  ;;  %v42_v23 = vld [vmem:[%s1409_s0 + $0x78] sm:$0xff]  ;;  %v46_v24 = vpack.c.bf16 %v34_v21, %v33_v20  ;;  %v924_v27 = vld [vmem:[%s1410_s3 + $0x10] sm:$0xff]   ;;  %v926_v29 = vld [vmem:[%s1410_s3] sm:$0xff]  }
   0x8   :  { %v50_v25 = vpack.c.bf16 %v42_v23, %v41_v22  ;;  %v923_v26 = vld [vmem:[%s1410_s3 + $0x18] sm:$0xff]   ;;  %v1112_v30 = vld [vmem:[%s1411_s2] ss:$0 sm:$0xff] }
   0x9   :  { %869 = vmatprep.subr.bf16.mxu1 %v923_v26 }
   0xa   :  { %854 = vmatmul.mubr.msk.bf16.vlgmr.msra.gmra.mxu0 %vm74_vm0, %v44_v16  ;;  %862 = vmatmul.mubr.msk.bf16.vlgmr.msra.gmra.mxu1 %vm74_vm0, %v48_v17 }
   0xb   :  { %857 = vmatprep.mubr.msk.bf16.mxu0 %vm74_vm0, %v45_v18  ;;  %865 = vmatprep.mubr.msk.bf16.mxu1 %vm74_vm0, %v49_v19 }
   0xc   :  { %870 = vmatpush3.bf16.msra.mxu1 %v923_v26 }
   0xd   :  { %871 = vmatprep.subr.bf16.mxu1 %v924_v27 }
  0x10   :  { %872 = vmatpush3.bf16.msra.mxu1 %v924_v27 }
  0x11   :  { %873 = vmatprep.subr.bf16.mxu1 %v925_v28 }
  0x12   :  { %858 = vmatmul.mubr.msk.bf16.gmra.mxu0 %vm74_vm0, %v46_v24  ;;  %866 = vmatmul.mubr.msk.bf16.gmra.mxu1 %vm74_vm0, %v50_v25 }
  0x14   :  { %874 = vmatpush3.bf16.msra.mxu1 %v925_v28 }
  0x15   :  { %875 = vmatprep.subr.bf16.mxu1 %v926_v29 }
  0x18   :  { %876 = vmatpush3.bf16.msra.mxu1 %v926_v29 }
  0xca   :  { %v855_v31 = vpop.f32.mrf.mxu0  ;;  %v863_v32 = vpop.f32.mrf.mxu1 }
  0xcb   :  { %v1115_v33 = vadd.f32 %v855_v31, %v1112_v30  ;;  %v1154_v8 = vadd.f32 %v863_v32, %v1112_v30 }
  0xcc   :  { %v133_v34 = vpop.f32.mrf.mxu0  ;;  %v165_v35 = vpop.f32.mrf.mxu1 }
  0xcd   :  { %v214_v36 = vmin.f32 %v1115_v33, 0.0  ;;  %v1119_v37 = vadd.f32 %v1112_v30, %v133_v34  ;;  %v1136_v53 = vadd.f32 %v1112_v30, %v165_v35  ;;  %v222_v17 = vmin.f32 %v1154_v8, 0.0 }
  0xce   :  { %v856_v38 = vpop.f32.mrf.mxu0  ;;  %v864_v39 = vpop.f32.mrf.mxu1  ;;  %vm198_vm5 = vcmp.gt.f32.partialorder %v1115_v33, 0.0  ;;  %vm206_vm14 = vcmp.gt.f32.partialorder %v1154_v8, 0.0 }
  0xcf   :  { %v1122_v40 = vadd.f32 %v856_v38, %v1112_v30  ;;  %v232_v41 = vmul.f32 1.442695, %v214_v36  ;;  %v212_v42 = vmin.f32 %v1119_v37, 0.0  ;;  %v220_v62 = vmin.f32 %v1136_v53, 0.0 }
  0xd0   :  { %v136_v43 = vpop.f32.mrf.mxu0  ;;  %v168_v44 = vpop.f32.mrf.mxu1  ;;  %v1149_v2 = vadd.f32 %v864_v39, %v1112_v30  ;;  %v248_v27 = vmul.f32 1.442695, %v222_v17  ;;  %vm196_vm2 = vcmp.gt.f32.partialorder %v1119_v37, 0.0  ;;  %vm204_vm11 = vcmp.gt.f32.partialorder %v1136_v53, 0.0 }
  0xd1   :  { %v215_v45 = vmin.f32 %v1122_v40, 0.0  ;;  %v228_v46 = vmul.f32 1.442695, %v212_v42  ;;  %v1127_v50 = vadd.f32 %v1112_v30, %v136_v43  ;;  %v1130_v51 = vadd.f32 %v1112_v30, %v168_v44 }
  0xd2   :  { %v859_v47 = vpop.f32.mrf.mxu0  ;;  %v867_v48 = vpop.f32.mrf.mxu1  ;;  %931 = vpow2.f32 %v232_v41  ;;  %v244_v9 = vmul.f32 1.442695, %v220_v62  ;;  %v223_v15 = vmin.f32 %v1149_v2, 0.0  ;;  %vm199_vm3 = vcmp.gt.f32.partialorder %v1122_v40, 0.0 }
  0xd3   :  { %v234_v49 = vmul.f32 1.442695, %v215_v45  ;;  %v1133_v52 = vadd.f32 %v859_v47, %v1112_v30  ;;  %933 = vpow2.f32 %v228_v46  ;;  %v213_v56 = vmin.f32 %v1127_v50, 0.0 }
  0xd4   :  { %v149_v54 = vpop.f32.mrf.mxu0  ;;  %v181_v55 = vpop.f32.mrf.mxu1  ;;  %v221_v57 = vmin.f32 %v1130_v51, 0.0  ;;  %v250_v23 = vmul.f32 1.442695, %v223_v15  ;;  %v1174_v29 = vadd.f32 %v867_v48, %v1112_v30  ;;  %vm197_vm4 = vcmp.gt.f32.partialorder %v1127_v50, 0.0 }
  0xd5   :  { %935 = vpow2.f32 %v234_v49  ;;  %v218_v58 = vmin.f32 %v1133_v52, 0.0  ;;  %v230_v61 = vmul.f32 1.442695, %v213_v56  ;;  %v1143_v63 = vadd.f32 %v1112_v30, %v149_v54 }
  0xd6   :  { %v860_v59 = vpop.f32.mrf.mxu0  ;;  %v868_v60 = vpop.f32.mrf.mxu1  ;;  %v246_v0 = vmul.f32 1.442695, %v221_v57  ;;  %v1157_v11 = vadd.f32 %v1112_v30, %v181_v55  ;;  %vm205_vm7 = vcmp.gt.f32.partialorder %v1130_v51, 0.0  ;;  %vm202_vm10 = vcmp.gt.f32.partialorder %v1133_v52, 0.0 }
  0xd7   :  { %937 = vpow2.f32 %v230_v61  ;;  %v1146_v1 = vadd.f32 %v860_v59, %v1112_v30  ;;  %v240_v3 = vmul.f32 1.442695, %v218_v58  ;;  %v216_v4 = vmin.f32 %v1143_v63, 0.0 }
  0xd8   :  { %v152_v5 = vpop.f32.mrf.mxu0  ;;  %v184_v6 = vpop.f32.mrf.mxu1  ;;  %939 = vpow2.f32 %v246_v0  ;;  %v224_v20 = vmin.f32 %v1157_v11, 0.0  ;;  %v1171_v24 = vadd.f32 %v868_v60, %v1112_v30  ;;  %vm200_vm8 = vcmp.gt.f32.partialorder %v1143_v63, 0.0 }
  0xd9   :  { %v219_v7 = vmin.f32 %v1146_v1, 0.0  ;;  %v236_v10 = vmul.f32 1.442695, %v216_v4  ;;  %v1160_v13 = vadd.f32 %v1112_v30, %v152_v5  ;;  %v1163_v14 = vadd.f32 %v1112_v30, %v184_v6 }
  0xda   :  { %941 = vpow2.f32 %v240_v3  ;;  %v252_v32 = vmul.f32 1.442695, %v224_v20  ;;  %v227_v36 = vmin.f32 %v1171_v24, 0.0  ;;  %v226_v30 = vmin.f32 %v1174_v29, 0.0 }
  0xdb   :  { %v242_v12 = vmul.f32 1.442695, %v219_v7  ;;  %943 = vpow2.f32 %v236_v10  ;;  %v217_v16 = vmin.f32 %v1160_v13, 0.0  ;;  %v225_v18 = vmin.f32 %v1163_v14, 0.0 }
  0xdc   :  { %v258_v46 = vmul.f32 1.442695, %v227_v36  ;;  %vm203_vm6 = vcmp.gt.f32.partialorder %v1146_v1, 0.0  ;;  %vm201_vm9 = vcmp.gt.f32.partialorder %v1160_v13, 0.0  ;;  %vm207_vm12 = vcmp.gt.f32.partialorder %v1149_v2, 0.0 }
  0xdd   :  { %945 = vpow2.f32 %v242_v12  ;;  %v238_v21 = vmul.f32 1.442695, %v217_v16  ;;  %v254_v26 = vmul.f32 1.442695, %v225_v18  ;;  %vm209_vm13 = vcmp.gt.f32.partialorder %v1163_v14, 0.0 }
  0xde   :  { %947 = vpow2.f32 %v244_v9  ;;  %vm208_vm15 = vcmp.gt.f32.partialorder %v1157_v11, 0.0  ;;  %vm211_vm0 = vcmp.gt.f32.partialorder %v1171_v24, 0.0 }
  0xdf   :  { %v932_v19 = vpop.eup %931  ;;  %949 = vpow2.f32 %v238_v21 }
  0xe0   :  { %v934_v22 = vpop.eup %933  ;;  %v759_v35 = vadd.f32 -1.0, %v932_v19  ;;  %951 = vpow2.f32 %v250_v23 }
  0xe1   :  { %v757_v31 = vadd.f32 -1.0, %v934_v22  ;;  %953 = vpow2.f32 %v254_v26  ;;  %v930_v26 = vld [vmem:[%s1412_s5] sm:$0xff]  }
  0xe2   :  { %v936_v25 = vpop.eup %935  ;;  %955 = vpow2.f32 %v248_v27  ;;  %v278_v44 = vsel %vm198_vm5, %v1115_v33, %v759_v35  ;;  %v1233_v27 = vld [vmem:[%s1413_s4] ss:$0 sm:$0xff] }
  0xe3   :  { %v760_v28 = vadd.f32 -1.0, %v936_v25  ;;  %v276_v41 = vsel %vm196_vm2, %v1119_v37, %v757_v31  ;;  %957 = vpow2.f32 %v252_v32  ;;  %vm210_vm2 = vcmp.gt.f32.partialorder %v1174_v29, 0.0  ;;  %v928_v25 = vld [vmem:[%s1412_s5 + $0x10] sm:$0xff]  }
  0xe4   :  { %v938_v34 = vpop.eup %937  ;;  %959 = vpow2.f32 %v258_v46 }
  0xe5   :  { %v758_v38 = vadd.f32 -1.0, %v938_v34  ;;  %v279_v39 = vsel %vm199_vm3, %v1122_v40, %v760_v28  ;;  %v940_v43 = vpop.eup %939  ;;  %v256_v40 = vmul.f32 1.442695, %v226_v30 }
  0xe6   :  { %v293_v48 = vpack.c.bf16 %v279_v39, %v278_v44  ;;  %v766_v37 = vadd.f32 -1.0, %v940_v43 }
  0xe7   :  { %v277_v42 = vsel %vm197_vm4, %v1127_v50, %v758_v38  ;;  %v942_v47 = vpop.eup %941  ;;  %961 = vpow2.f32 %v256_v40 }
  0xe8   :  { %v292_v45 = vpack.c.bf16 %v277_v42, %v276_v41  ;;  %v944_v49 = vpop.eup %943  ;;  %v763_v58 = vadd.f32 -1.0, %v942_v47  ;;  %v285_v62 = vsel %vm205_vm7, %v1130_v51, %v766_v37 }
  0xe9   :  { %v761_v50 = vadd.f32 -1.0, %v944_v49 }
  0xea   :  { %877 = vmatprep.mubr.msk.bf16.mxu1 %vm339_vm1, %v292_v45  ;;  %v946_v54 = vpop.eup %945  ;;  %v282_v5 = vsel %vm202_vm10, %v1133_v52, %v763_v58 }
  0xeb   :  { %878 = vmatmul.mubr.msk.bf16.vlgmr.msra.gmra.mxu1 %vm339_vm1, %v293_v48  ;;  %v948_v55 = vpop.eup %947  ;;  %v764_v56 = vadd.f32 -1.0, %v946_v54  ;;  %v280_v0 = vsel %vm200_vm8, %v1143_v63, %v761_v50 }
  0xec   :  { %v950_v57 = vpop.eup %949  ;;  %v765_v33 = vadd.f32 -1.0, %v948_v55 }
  0xed   :  { %v762_v59 = vadd.f32 -1.0, %v950_v57  ;;  %v283_v60 = vsel %vm203_vm6, %v1146_v1, %v764_v56  ;;  %v952_v61 = vpop.eup %951 }
  0xee   :  { %v954_v4 = vpop.eup %953  ;;  %v284_v1 = vsel %vm204_vm11, %v1136_v53, %v765_v33  ;;  %v295_v9 = vpack.c.bf16 %v283_v60, %v282_v5  ;;  %v768_v12 = vadd.f32 -1.0, %v952_v61 }
  0xef   :  { %v281_v3 = vsel %vm201_vm9, %v1160_v13, %v762_v59  ;;  %v956_v7 = vpop.eup %955  ;;  %v296_v15 = vpack.c.bf16 %v285_v62, %v284_v1  ;;  %v770_v51 = vadd.f32 -1.0, %v954_v4 }
  0xf0   :  { %v294_v6 = vpack.c.bf16 %v281_v3, %v280_v0  ;;  %v958_v10 = vpop.eup %957  ;;  %v767_v63 = vadd.f32 -1.0, %v956_v7  ;;  %v287_v52 = vsel %vm207_vm12, %v1149_v2, %v768_v12 }
  0xf1   :  { %v769_v13 = vadd.f32 -1.0, %v958_v10  ;;  %v960_v53 = vpop.eup %959  ;;  %v289_v16 = vsel %vm209_vm13, %v1163_v14, %v770_v51 }
  0xf2   :  { %881 = vmatprep.mubr.msk.bf16.mxu1 %vm339_vm1, %v294_v6  ;;  %v286_v17 = vsel %vm206_vm14, %v1154_v8, %v767_v63  ;;  %v772_v21 = vadd.f32 -1.0, %v960_v53 }
  0xf3   :  { %882 = vmatmul.mubr.msk.bf16.gmra.mxu1 %vm339_vm1, %v295_v9  ;;  %v297_v19 = vpack.c.bf16 %v287_v52, %v286_v17  ;;  %v288_v20 = vsel %vm208_vm15, %v1157_v11, %v769_v13  ;;  %v927_v11 = vld [vmem:[%s1412_s5 + $0x18] sm:$0xff]  }
  0xf4   :  { %885 = vmatprep.mubr.msk.bf16.mxu1 %vm339_vm1, %v296_v15  ;;  %v962_v18 = vpop.eup %961  ;;  %v298_v22 = vpack.c.bf16 %v289_v16, %v288_v20  ;;  %v291_v23 = vsel %vm211_vm0, %v1171_v24, %v772_v21  ;;  %893 = vmatprep.subr.bf16.mxu0 %v927_v11  ;;  %v929_v24 = vld [vmem:[%s1412_s5 + $0x8] sm:$0xff]  }
  0xf5   :  { %v771_v2 = vadd.f32 -1.0, %v962_v18  ;;  %894 = vmatpush3.bf16.msra.mxu0 %v927_v11 }
  0xf6   :  { %895 = vmatprep.subr.bf16.mxu0 %v928_v25 }
  0xf7   :  { %v290_v8 = vsel %vm210_vm2, %v1174_v29, %v771_v2 }
  0xf8   :  { %v299_v14 = vpack.c.bf16 %v291_v23, %v290_v8 }
  0xf9   :  { %896 = vmatpush3.bf16.msra.mxu0 %v928_v25 }
  0xfa   :  { %897 = vmatprep.subr.bf16.mxu0 %v929_v24 }
  0xfb   :  { %886 = vmatmul.mubr.msk.bf16.gmra.mxu1 %vm339_vm1, %v297_v19 }
  0xfc   :  { %889 = vmatprep.mubr.msk.bf16.mxu1 %vm339_vm1, %v298_v22 }
  0xfd   :  { %898 = vmatpush3.bf16.msra.mxu0 %v929_v24 }
  0xfe   :  { %899 = vmatprep.subr.bf16.mxu0 %v930_v26 }
 0x101   :  { %900 = vmatpush3.bf16.msra.mxu0 %v930_v26 }
 0x103   :  { %890 = vmatmul.mubr.msk.bf16.gmra.mxu1 %vm339_vm1, %v299_v14 }
 0x1ab   :  { %v879_v28 = vpop.f32.mrf.mxu1 }
 0x1ac   :  { %v1236_v29 = vadd.f32 %v879_v28, %v1233_v27 }
 0x1ad   :  { %v398_v31 = vpop.f32.mrf.mxu1 }
 0x1ae   :  { %v479_v32 = vmin.f32 %v1236_v29, 0.0  ;;  %v1240_v34 = vadd.f32 %v1233_v27, %v398_v31  ;;  %vm463_vm3 = vcmp.gt.f32.partialorder %v1236_v29, 0.0 }
 0x1af   :  { %v880_v35 = vpop.f32.mrf.mxu1 }
 0x1b0   :  { %v497_v36 = vmul.f32 1.442695, %v479_v32  ;;  %v477_v38 = vmin.f32 %v1240_v34, 0.0  ;;  %v1244_v39 = vadd.f32 %v880_v35, %v1233_v27  ;;  %vm461_vm4 = vcmp.gt.f32.partialorder %v1240_v34, 0.0 }
 0x1b1   :  { %v401_v30 = vpop.f32.mrf.mxu1 }
 0x1b2   :  { %v493_v41 = vmul.f32 1.442695, %v477_v38  ;;  %v480_v42 = vmin.f32 %v1244_v39, 0.0  ;;  %v1248_v43 = vadd.f32 %v1233_v27, %v401_v30  ;;  %963 = vpow2.f32 %v497_v36 }
 0x1b3   :  { %v883_v46 = vpop.f32.mrf.mxu1  ;;  %vm464_vm5 = vcmp.gt.f32.partialorder %v1244_v39, 0.0 }
 0x1b4   :  { %v499_v44 = vmul.f32 1.442695, %v480_v42  ;;  %965 = vpow2.f32 %v493_v41  ;;  %v478_v45 = vmin.f32 %v1248_v43, 0.0  ;;  %v1252_v47 = vadd.f32 %v883_v46, %v1233_v27 }
 0x1b5   :  { %v414_v49 = vpop.f32.mrf.mxu1  ;;  %vm462_vm6 = vcmp.gt.f32.partialorder %v1248_v43, 0.0 }
 0x1b6   :  { %967 = vpow2.f32 %v499_v44  ;;  %v495_v48 = vmul.f32 1.442695, %v478_v45  ;;  %v483_v40 = vmin.f32 %v1252_v47, 0.0  ;;  %v1256_v54 = vadd.f32 %v1233_v27, %v414_v49 }
 0x1b7   :  { %v884_v55 = vpop.f32.mrf.mxu1  ;;  %vm467_vm10 = vcmp.gt.f32.partialorder %v1252_v47, 0.0 }
 0x1b8   :  { %969 = vpow2.f32 %v495_v48  ;;  %v505_v56 = vmul.f32 1.442695, %v483_v40  ;;  %v481_v37 = vmin.f32 %v1256_v54, 0.0  ;;  %v1260_v50 = vadd.f32 %v884_v55, %v1233_v27 }
 0x1b9   :  { %v417_v57 = vpop.f32.mrf.mxu1  ;;  %vm465_vm8 = vcmp.gt.f32.partialorder %v1256_v54, 0.0 }
 0x1ba   :  { %v501_v58 = vmul.f32 1.442695, %v481_v37  ;;  %v484_v33 = vmin.f32 %v1260_v50, 0.0  ;;  %v1264_v59 = vadd.f32 %v1233_v27, %v417_v57  ;;  %971 = vpow2.f32 %v505_v56 }
 0x1bb   :  { %v887_v60 = vpop.f32.mrf.mxu1  ;;  %vm468_vm7 = vcmp.gt.f32.partialorder %v1260_v50, 0.0 }
 0x1bc   :  { %v507_v61 = vmul.f32 1.442695, %v484_v33  ;;  %v1267_v62 = vadd.f32 %v887_v60, %v1233_v27  ;;  %973 = vpow2.f32 %v501_v58  ;;  %v482_v0 = vmin.f32 %v1264_v59, 0.0 }
 0x1bd   :  { %v430_v3 = vpop.f32.mrf.mxu1  ;;  %vm466_vm9 = vcmp.gt.f32.partialorder %v1264_v59, 0.0 }
 0x1be   :  { %975 = vpow2.f32 %v507_v61  ;;  %v487_v4 = vmin.f32 %v1267_v62, 0.0  ;;  %v503_v6 = vmul.f32 1.442695, %v482_v0  ;;  %v1272_v7 = vadd.f32 %v1233_v27, %v430_v3 }
 0x1bf   :  { %v964_v5 = vpop.eup %963  ;;  %v888_v1 = vpop.f32.mrf.mxu1  ;;  %vm471_vm14 = vcmp.gt.f32.partialorder %v1267_v62, 0.0 }
 0x1c0   :  { %v1275_v10 = vadd.f32 %v888_v1, %v1233_v27  ;;  %977 = vpow2.f32 %v503_v6  ;;  %v513_v15 = vmul.f32 1.442695, %v487_v4  ;;  %v485_v51 = vmin.f32 %v1272_v7, 0.0 }
 0x1c1   :  { %v966_v9 = vpop.eup %965  ;;  %v433_v63 = vpop.f32.mrf.mxu1  ;;  %v788_v20 = vadd.f32 -1.0, %v964_v5  ;;  %vm469_vm12 = vcmp.gt.f32.partialorder %v1272_v7, 0.0 }
 0x1c2   :  { %v786_v52 = vadd.f32 -1.0, %v966_v9  ;;  %v509_v53 = vmul.f32 1.442695, %v485_v51  ;;  %v488_v16 = vmin.f32 %v1275_v10, 0.0  ;;  %v1281_v17 = vadd.f32 %v1233_v27, %v433_v63 }
 0x1c3   :  { %v968_v12 = vpop.eup %967  ;;  %v891_v18 = vpop.f32.mrf.mxu1  ;;  %979 = vpow2.f32 %v513_v15  ;;  %v543_v31 = vsel %vm463_vm3, %v1236_v29, %v788_v20  ;;  %vm472_vm11 = vcmp.gt.f32.partialorder %v1275_v10, 0.0 }
 0x1c4   :  { %v789_v13 = vadd.f32 -1.0, %v968_v12  ;;  %v1286_v21 = vadd.f32 %v891_v18, %v1233_v27  ;;  %v515_v2 = vmul.f32 1.442695, %v488_v16  ;;  %981 = vpow2.f32 %v509_v53 }
 0x1c5   :  { %v970_v19 = vpop.eup %969  ;;  %v446_v23 = vpop.f32.mrf.mxu1  ;;  %v486_v14 = vmin.f32 %v1281_v17, 0.0  ;;  %v541_v25 = vsel %vm461_vm4, %v1240_v34, %v786_v52  ;;  %vm470_vm13 = vcmp.gt.f32.partialorder %v1281_v17, 0.0  ;;  %vm725_vm4 = vcmask 15360  }
 0x1c6   :  { %v787_v22 = vadd.f32 -1.0, %v970_v19  ;;  %v544_v8 = vsel %vm464_vm5, %v1244_v39, %v789_v13  ;;  %v491_v11 = vmin.f32 %v1286_v21, 0.0  ;;  %983 = vpow2.f32 %v515_v2 }
 0x1c7   :  { %v1295_v26 = vadd.f32 %v1233_v27, %v446_v23  ;;  %v892_v28 = vpop.f32.mrf.mxu1  ;;  %v511_v35 = vmul.f32 1.442695, %v486_v14  ;;  %v972_v36 = vpop.eup %971  ;;  %v558_v38 = vpack.c.bf16 %v544_v8, %v543_v31  ;;  %vm475_vm3 = vcmp.gt.f32.partialorder %v1286_v21, 0.0  ;;  %v802_v8 = vld [vmem:[%s1414_s6] ss:$0 sm:$0xff] }
 0x1c8   :  { %v542_v24 = vsel %vm462_vm6, %v1248_v43, %v787_v22  ;;  %v1302_v30 = vadd.f32 %v892_v28, %v1233_v27  ;;  %v521_v42 = vmul.f32 1.442695, %v491_v11  ;;  %v792_v56 = vadd.f32 -1.0, %v972_v36 }
 0x1c9   :  { %v557_v32 = vpack.c.bf16 %v542_v24, %v541_v25  ;;  %v489_v39 = vmin.f32 %v1295_v26, 0.0  ;;  %v449_v34 = vpop.f32.mrf.mxu1  ;;  %v974_v41 = vpop.eup %973  ;;  %985 = vpow2.f32 %v511_v35  ;;  %vm473_vm15 = vcmp.gt.f32.partialorder %v1295_v26, 0.0 }
 0x1ca   :  { %v1305_v43 = vadd.f32 %v1233_v27, %v449_v34  ;;  %v492_v45 = vmin.f32 %v1302_v30, 0.0  ;;  %v790_v49 = vadd.f32 -1.0, %v974_v41  ;;  %v547_v61 = vsel %vm467_vm10, %v1252_v47, %v792_v56 }
 0x1cb   :  { %901 = vmatprep.mubr.msk.bf16.mxu0 %vm339_vm1, %v557_v32  ;;  %v976_v44 = vpop.eup %975  ;;  %v517_v29 = vmul.f32 1.442695, %v489_v39  ;;  %vm476_vm2 = vcmp.gt.f32.partialorder %v1302_v30, 0.0 }
 0x1cc   :  { %902 = vmatmul.mubr.msk.bf16.vlgmr.msra.gmra.mxu0 %vm339_vm1, %v558_v38  ;;  %v793_v46 = vadd.f32 -1.0, %v976_v44  ;;  %v490_v48 = vmin.f32 %v1305_v43, 0.0  ;;  %v523_v40 = vmul.f32 1.442695, %v492_v45  ;;  %v545_v58 = vsel %vm465_vm8, %v1256_v54, %v790_v49 }
 0x1cd   :  { %987 = vpow2.f32 %v517_v29  ;;  %v978_v55 = vpop.eup %977  ;;  %vm474_vm0 = vcmp.gt.f32.partialorder %v1305_v43, 0.0 }
 0x1ce   :  { %989 = vpow2.f32 %v521_v42  ;;  %v519_v37 = vmul.f32 1.442695, %v490_v48  ;;  %v791_v27 = vadd.f32 -1.0, %v978_v55  ;;  %v548_v57 = vsel %vm468_vm7, %v1260_v50, %v793_v46 }
 0x1cf   :  { %991 = vpow2.f32 %v523_v40  ;;  %v560_v4 = vpack.c.bf16 %v548_v57, %v547_v61 }
 0x1d0   :  { %993 = vpow2.f32 %v519_v37  ;;  %v546_v33 = vsel %vm466_vm9, %v1264_v59, %v791_v27  ;;  %v980_v60 = vpop.eup %979 }
 0x1d1   :  { %v559_v0 = vpack.c.bf16 %v546_v33, %v545_v58  ;;  %v982_v3 = vpop.eup %981  ;;  %v796_v9 = vadd.f32 -1.0, %v980_v60 }
 0x1d2   :  { %v794_v50 = vadd.f32 -1.0, %v982_v3 }
 0x1d3   :  { %v984_v5 = vpop.eup %983  ;;  %905 = vmatprep.mubr.msk.bf16.mxu0 %vm339_vm1, %v559_v0  ;;  %v551_v63 = vsel %vm471_vm14, %v1267_v62, %v796_v9 }
 0x1d4   :  { %v797_v6 = vadd.f32 -1.0, %v984_v5  ;;  %906 = vmatmul.mubr.msk.bf16.gmra.mxu0 %vm339_vm1, %v560_v4  ;;  %v549_v12 = vsel %vm469_vm12, %v1272_v7, %v794_v50 }
 0x1d6   :  { %v986_v1 = vpop.eup %985  ;;  %v552_v59 = vsel %vm472_vm11, %v1275_v10, %v797_v6 }
 0x1d7   :  { %v795_v54 = vadd.f32 -1.0, %v986_v1  ;;  %v562_v53 = vpack.c.bf16 %v552_v59, %v551_v63 }
 0x1d9   :  { %v550_v15 = vsel %vm470_vm13, %v1281_v17, %v795_v54 }
 0x1da   :  { %v988_v47 = vpop.eup %987  ;;  %v561_v13 = vpack.c.bf16 %v550_v15, %v549_v12 }
 0x1db   :  { %v990_v51 = vpop.eup %989  ;;  %v798_v16 = vadd.f32 -1.0, %v988_v47 }
 0x1dc   :  { %v992_v52 = vpop.eup %991  ;;  %909 = vmatprep.mubr.msk.bf16.mxu0 %vm339_vm1, %v561_v13  ;;  %v800_v20 = vadd.f32 -1.0, %v990_v51 }
 0x1dd   :  { %v994_v18 = vpop.eup %993  ;;  %v801_v19 = vadd.f32 -1.0, %v992_v52  ;;  %910 = vmatmul.mubr.msk.bf16.gmra.mxu0 %vm339_vm1, %v562_v53  ;;  %v553_v7 = vsel %vm473_vm15, %v1295_v26, %v798_v16 }
 0x1de   :  { %v799_v10 = vadd.f32 -1.0, %v994_v18  ;;  %v555_v2 = vsel %vm475_vm3, %v1286_v21, %v800_v20 }
 0x1df   :  { %v556_v17 = vsel %vm476_vm2, %v1302_v30, %v801_v19 }
 0x1e0   :  { %v554_v62 = vsel %vm474_vm0, %v1305_v43, %v799_v10  ;;  %v564_v23 = vpack.c.bf16 %v556_v17, %v555_v2 }
 0x1e1   :  { %v563_v22 = vpack.c.bf16 %v554_v62, %v553_v7 }
 0x1e3   :  { %913 = vmatprep.mubr.msk.bf16.mxu0 %vm339_vm1, %v563_v22 }
 0x1e5   :  { %914 = vmatmul.mubr.msk.bf16.gmra.mxu0 %vm339_vm1, %v564_v23 }
 0x28c   :  { %v903_v14 = vpop.f32.mrf.mxu0 }
 0x28d   :  { %v671_v11 = vadd.f32 %v903_v14, %v802_v8 }
 0x28e   :  { %v662_v25 = vpop.f32.mrf.mxu0 }
 0x28f   :  { %728 = vst.msk [vmem:[%s1415_s7 + $0x10] sm:$0xff] %vm725_vm4, %v671_v11  ;;  %v663_v24 = vadd.f32 %v802_v8, %v662_v25 }
 0x290   :  { %v904_v21 = vpop.f32.mrf.mxu0 }
 0x291   :  { %726 = vst.msk [vmem:[%s1415_s7] sm:$0xff] %vm725_vm4, %v663_v24  ;;  %v674_v26 = vadd.f32 %v904_v21, %v802_v8 }
 0x292   :  { %v665_v28 = vpop.f32.mrf.mxu0 }
 0x293   :  { %729 = vst.msk [vmem:[%s1415_s7 + $0x18] sm:$0xff] %vm725_vm4, %v674_v26  ;;  %v666_v31 = vadd.f32 %v802_v8, %v665_v28 }
 0x294   :  { %v907_v32 = vpop.f32.mrf.mxu0 }
 0x295   :  { %727 = vst.msk [vmem:[%s1415_s7 + $0x8] sm:$0xff] %vm725_vm4, %v666_v31  ;;  %v687_v35 = vadd.f32 %v907_v32, %v802_v8 }
 0x296   :  { %v678_v36 = vpop.f32.mrf.mxu0 }
 0x297   :  { %732 = vst.msk [vmem:[%s1415_s7 + $0x30] sm:$0xff] %vm725_vm4, %v687_v35  ;;  %v679_v38 = vadd.f32 %v802_v8, %v678_v36 }
 0x298   :  { %v908_v39 = vpop.f32.mrf.mxu0 }
 0x299   :  { %730 = vst.msk [vmem:[%s1415_s7 + $0x20] sm:$0xff] %vm725_vm4, %v679_v38  ;;  %v690_v30 = vadd.f32 %v908_v39, %v802_v8 }
 0x29a   :  { %v681_v34 = vpop.f32.mrf.mxu0 }
 0x29b   :  { %733 = vst.msk [vmem:[%s1415_s7 + $0x38] sm:$0xff] %vm725_vm4, %v690_v30  ;;  %v682_v41 = vadd.f32 %v802_v8, %v681_v34 }
 0x29d   :  { %731 = vst.msk [vmem:[%s1415_s7 + $0x28] sm:$0xff] %vm725_vm4, %v682_v41  ;;  %v911_v42 = vpop.f32.mrf.mxu0 }
 0x29e   :  { %v703_v43 = vadd.f32 %v911_v42, %v802_v8 }
 0x29f   :  { %v694_v44 = vpop.f32.mrf.mxu0 }
 0x2a0   :  { %736 = vst.msk [vmem:[%s1415_s7 + $0x50] sm:$0xff] %vm725_vm4, %v703_v43  ;;  %v695_v29 = vadd.f32 %v802_v8, %v694_v44 }
 0x2a1   :  { %v912_v45 = vpop.f32.mrf.mxu0 }
 0x2a2   :  { %734 = vst.msk [vmem:[%s1415_s7 + $0x40] sm:$0xff] %vm725_vm4, %v695_v29  ;;  %v706_v46 = vadd.f32 %v912_v45, %v802_v8 }
 0x2a3   :  { %v697_v48 = vpop.f32.mrf.mxu0 }
 0x2a4   :  { %737 = vst.msk [vmem:[%s1415_s7 + $0x58] sm:$0xff] %vm725_vm4, %v706_v46  ;;  %v698_v49 = vadd.f32 %v802_v8, %v697_v48 }
 0x2a5   :  { %v915_v40 = vpop.f32.mrf.mxu0 }
 0x2a6   :  { %735 = vst.msk [vmem:[%s1415_s7 + $0x48] sm:$0xff] %vm725_vm4, %v698_v49  ;;  %v719_v55 = vadd.f32 %v915_v40, %v802_v8 }
 0x2a7   :  { %v710_v56 = vpop.f32.mrf.mxu0 }
 0x2a8   :  { %740 = vst.msk [vmem:[%s1415_s7 + $0x70] sm:$0xff] %vm725_vm4, %v719_v55  ;;  %v711_v37 = vadd.f32 %v802_v8, %v710_v56 }
 0x2a9   :  { %v916_v27 = vpop.f32.mrf.mxu0 }
 0x2aa   :  { %738 = vst.msk [vmem:[%s1415_s7 + $0x60] sm:$0xff] %vm725_vm4, %v711_v37  ;;  %v722_v57 = vadd.f32 %v916_v27, %v802_v8 }
 0x2ab   :  { %v713_v58 = vpop.f32.mrf.mxu0 }
 0x2ac   :  { %741 = vst.msk [vmem:[%s1415_s7 + $0x78] sm:$0xff] %vm725_vm4, %v722_v57  ;;  %v714_v33 = vadd.f32 %v802_v8, %v713_v58 }
 0x2ae   :  { %739 = vst.msk [vmem:[%s1415_s7 + $0x68] sm:$0xff] %vm725_vm4, %v714_v33 }

</bundles_post_ra>
